<compile_context>
chip_gen: v7x
topology: tpu7x:2x2x1
jax: 0.10.0
libtpu: 0.0.40
codegen_flags: <defaults>
</compile_context>

<pallas_src>
import functools

import jax
import jax.numpy as jnp
from jax.experimental import pallas as pl
from jax.experimental.pallas import tpu as pltpu


def _round_up(x, m):
    return ((x + m - 1) // m) * m


def _vmem_capacity_bytes():
    """Physical per-core VMEM (v5e/v6e: 128 MiB, v7x: 64 MiB); conservative fallback."""
    try:
        return int(pltpu.get_tpu_info().vmem_capacity_bytes)
    except Exception:
        return 64 * 1024 * 1024  # v7x-safe fallback


def _adapter_kernel(x_ref, wt_ref, scale_ref, shift_ref, o_ref):
    """One grid step: full-K bf16 matmul on the MXU + folded (dequant * BN) affine in f32."""
    w = wt_ref[...]
    if w.dtype != jnp.bfloat16:
        # int8 weight tile -> bf16 on the VPU (exact: |q| <= 127); per-column dequant
        # scale is folded into scale_ref, applied after the f32 accumulation.
        w = w.astype(jnp.float32).astype(jnp.bfloat16)
    acc = jnp.dot(x_ref[...], w, preferred_element_type=jnp.float32)
    o_ref[...] = acc * scale_ref[...] + shift_ref[...]


@functools.partial(jax.jit, static_argnames=("dout", "tn", "tm_max"))
def adapter_matmul_bn(x2d, w_t_p, scale2d_p, shift2d_p, *, dout, tn, tm_max=256):
    """x2d: (M, Din) float.  w_t_p: (Din_p, Dout_p) int8/bf16 (pre-padded).
    scale2d_p/shift2d_p: (1, Dout_p) f32.  Returns (M, dout) f32."""
    M, Din = x2d.shape
    Din_p, Dout_p = w_t_p.shape
    assert Din_p % 128 == 0 and Dout_p % tn == 0 and tn % 128 == 0

    # Row tiling: bf16 packs 16 sublanes per vreg -> round M to 16; cap tm to bound VMEM.
    Mp = _round_up(max(M, 16), 16)
    tm = min(tm_max, Mp)
    Mp = _round_up(Mp, tm)

    # bf16 activations for the MXU; zero-pad M and Din (zeros contribute nothing).
    x = x2d.astype(jnp.bfloat16)
    if Mp != M or Din_p != Din:
        x = jnp.pad(x, ((0, Mp - M), (0, Din_p - Din)))

    nj, ni = Dout_p // tn, Mp // tm
    w_el = w_t_p.dtype.itemsize
    x_total = Mp * Din_p * 2
    w_total = Din_p * Dout_p * w_el

    # Grid-order choice minimizing total HBM traffic:
    #   j-outer (skinny M): weight streamed once, X strip re-read nj times.
    #   i-outer (large  M): X streamed once, weight re-read ni times.
    j_outer = (w_total + nj * x_total) <= (x_total + ni * w_total)
    if j_outer:
        grid = (nj, ni)
        x_spec = pl.BlockSpec((tm, Din_p), lambda j, i: (i, 0))
        w_spec = pl.BlockSpec((Din_p, tn), lambda j, i: (0, j))
        v_spec = pl.BlockSpec((1, tn), lambda j, i: (0, j))
        o_spec = pl.BlockSpec((tm, tn), lambda j, i: (i, j))
    else:
        grid = (ni, nj)
        x_spec = pl.BlockSpec((tm, Din_p), lambda i, j: (i, 0))
        w_spec = pl.BlockSpec((Din_p, tn), lambda i, j: (0, j))
        v_spec = pl.BlockSpec((1, tn), lambda i, j: (0, j))
        o_spec = pl.BlockSpec((tm, tn), lambda i, j: (i, j))

    # Scoped-VMEM request sized to the actual double-buffered tiles (+ headroom),
    # never the whole physical VMEM (64 MiB == all of v7x per-TC VMEM).
    cap = _vmem_capacity_bytes()
    need = 2 * (tm * Din_p * 2 + Din_p * tn * w_el + tm * tn * 4 + 2 * tn * 4)
    vmem_limit = min(int(cap * 0.75), max(need + (8 << 20), 32 << 20))

    out = pl.pallas_call(
        _adapter_kernel,
        out_shape=jax.ShapeDtypeStruct((Mp, Dout_p), jnp.float32),
        grid_spec=pltpu.PrefetchScalarGridSpec(
            num_scalar_prefetch=0,
            grid=grid,
            in_specs=[x_spec, w_spec, v_spec, v_spec],
            out_specs=o_spec,
        ),
        compiler_params=pltpu.CompilerParams(
            # Outer axis carries the 2-TC / megacore split (Dout strips for skinny M),
            # inner axis stays "arbitrary" so cores never duplicate the weight stream.
            dimension_semantics=("parallel", "arbitrary"),
            vmem_limit_bytes=vmem_limit,
        ),
    )(x, w_t_p, scale2d_p, shift2d_p)

    return out[:M, :dout]


class AdapterEncPallas:
    """JAX/Pallas equivalent of _AdapterEnc forward (eval-mode BatchNorm)."""

    def __init__(self, nb_output_bins=2049, nb_in_channels=4, nb_out_channels=2,
                 key=jax.random.PRNGKey(0), eps=1e-5, weight_dtype="int8"):
        self.nb_output_bins = nb_output_bins
        self.nb_in_channels = nb_in_channels
        self.nb_out_channels = nb_out_channels
        self.eps = eps
        self.din = nb_output_bins * nb_in_channels
        self.dout = nb_output_bins * nb_out_channels

        kw, kg, kb, km, kv = jax.random.split(key, 5)
        # Linear weight, PyTorch layout (out_features, in_features), no bias.
        self.weight = (jax.random.normal(kw, (self.dout, self.din), jnp.float32)
                       * (1.0 / jnp.sqrt(self.din)))
        # BatchNorm1d params + running stats (deterministic synthetic values).
        self.gamma = 1.0 + 0.1 * jax.random.normal(kg, (self.dout,), jnp.float32)
        self.beta = 0.1 * jax.random.normal(kb, (self.dout,), jnp.float32)
        self.running_mean = 0.05 * jax.random.normal(km, (self.dout,), jnp.float32)
        self.running_var = 1.0 + 0.1 * jax.random.uniform(kv, (self.dout,), jnp.float32)

        self._prepare_kernel_params(weight_dtype)

    def _prepare_kernel_params(self, weight_dtype):
        """One-time: fold BN, transpose/quantize/pad the weight (no per-call HBM passes)."""
        din, dout = self.din, self.dout

        # Fold eval-mode BatchNorm into a per-feature affine (f32).
        bn_scale = self.gamma / jnp.sqrt(self.running_var + self.eps)
        bn_shift = self.beta - self.running_mean * bn_scale

        # Pad Din/Dout only to multiples of 128 (no tn-sized over-padding of Dout).
        din_p = _round_up(din, 128)
        dout_p = _round_up(dout, 128)

        w_el = 1 if weight_dtype == "int8" else 2
        tm_max = 256

        # tn: largest multiple of 128 that DIVIDES dout_p and whose full double-buffered
        # tile set (X strip + W strip + f32 out tile) fits ~50% of this generation's VMEM.
        cap = _vmem_capacity_bytes()
        budget = cap // 2
        tn = 128
        for cand in range(dout_p, 127, -128):
            if dout_p % cand:
                continue
            need = 2 * (tm_max * din_p * 2 + din_p * cand * w_el + tm_max * cand * 4)
            if need <= budget:
                tn = cand
                break

        self.tn = tn
        self.tm_max = tm_max
        self.din_p = din_p
        self.dout_p = dout_p

        # Pre-transposed weight (Din, Dout); per-output-channel int8 quantization with
        # the dequant scale folded into the BN scale (free: the multiply already exists).
        w_t = self.weight.T.astype(jnp.float32)
        if weight_dtype == "int8":
            absmax = jnp.max(jnp.abs(w_t), axis=0)                       # (dout,)
            qscale = jnp.where(absmax > 0, absmax / 127.0, 1.0)
            w_store = jnp.clip(jnp.round(w_t / qscale), -127, 127).astype(jnp.int8)
        else:
            qscale = jnp.ones((dout,), jnp.float32)
            w_store = w_t.astype(jnp.bfloat16)
        self.qscale = qscale

        self.w_t_p = jnp.pad(w_store, ((0, din_p - din), (0, dout_p - dout)))
        self.scale2d = jnp.pad(bn_scale * qscale, (0, dout_p - dout)).reshape(1, dout_p)
        self.shift2d = jnp.pad(bn_shift, (0, dout_p - dout)).reshape(1, dout_p)

    def __call__(self, x, shapes):
        nb_frames, nb_samples, nb_channels, _ = shapes
        # Row-major flatten (channel-major, bins fastest) == PyTorch reshape(-1, bins*in_ch).
        x2d = x.reshape(-1, self.din).astype(jnp.float32)
        y = adapter_matmul_bn(x2d, self.w_t_p, self.scale2d, self.shift2d,
                              dout=self.dout, tn=self.tn, tm_max=self.tm_max)
        return y.reshape(nb_frames, nb_samples, self.nb_out_channels,
                         self.nb_output_bins)


if __name__ == "__main__":
    # Small shapes consistent with the module: frames=8, samples=1, in_ch=4, bins=256.
    nb_frames, nb_samples = 8, 1
    nb_in_channels, nb_out_channels = 4, 2
    nb_output_bins = 256

    key = jax.random.PRNGKey(0)
    kx, kp = jax.random.split(key)
    x = jax.random.normal(
        kx, (nb_frames, nb_samples, nb_in_channels, nb_output_bins), jnp.float32
    )
    shapes = (nb_frames, nb_samples, nb_in_channels, nb_output_bins)

    model = AdapterEncPallas(nb_output_bins, nb_in_channels, nb_out_channels, key=kp)
    out = model(x, shapes)
    out = jax.block_until_ready(out)
    assert out.shape == (nb_frames, nb_samples, nb_out_channels, nb_output_bins)

    # Reference checks in plain JAX.
    x2d = x.reshape(-1, nb_output_bins * nb_in_channels)
    bn_scale = model.gamma / jnp.sqrt(model.running_var + model.eps)
    bn_shift = model.beta - model.running_mean * bn_scale

    # Quantization-consistent reference (same int8 weights / bf16 matmul as the kernel)
    # -> tight check.
    w_q_f = jnp.asarray(model.w_t_p[:model.din, :model.dout], jnp.float32)
    ref_q = (jnp.dot(x2d.astype(jnp.bfloat16), w_q_f.astype(jnp.bfloat16),
                     preferred_element_type=jnp.float32)
             * (model.qscale * bn_scale) + bn_shift).reshape(out.shape)
    assert jnp.allclose(out, ref_q, atol=5e-3, rtol=5e-3)

    # Full-f32 reference -> loose check (int8 weight + bf16 activation rounding).
    ref_f32 = ((x2d @ model.weight.T) * bn_scale + bn_shift).reshape(out.shape)
    assert jnp.allclose(out, ref_f32, atol=5e-2, rtol=5e-2)

    print("KERNEL_OK")
</pallas_src>

<mosaic_0001>
module attributes {stable_mosaic.version = 11 : i64} {
  func.func @_adapter_kernel(%arg0: i32, %arg1: i32, %arg2: memref<16x1024xbf16, #tpu.memory_space<vmem>>, %arg3: memref<1024x512xi8, #tpu.memory_space<vmem>>, %arg4: memref<1x512xf32, #tpu.memory_space<vmem>>, %arg5: memref<1x512xf32, #tpu.memory_space<vmem>>, %arg6: memref<16x512xf32, #tpu.memory_space<vmem>>) attributes {dimension_semantics = [#tpu.dimension_semantics<parallel>, #tpu.dimension_semantics<arbitrary>], iteration_bounds = array<i64: 1, 1>, scalar_prefetch = 0 : i64, scratch_operands = 0 : i64, tpu.core_type = #tpu.core_type<tc>, window_params = [{transform_indices = @transform_0, window_bounds = array<i64: 16, 1024>}, {transform_indices = @transform_1, window_bounds = array<i64: 1024, 512>}, {transform_indices = @transform_2, window_bounds = array<i64: 1, 512>}, {transform_indices = @transform_3, window_bounds = array<i64: 1, 512>}, {transform_indices = @transform_4, window_bounds = array<i64: 16, 512>}]} {
    %c0 = arith.constant 0 : index
    %c0_0 = arith.constant 0 : index
    %0 = vector.load %arg3[%c0, %c0_0] : memref<1024x512xi8, #tpu.memory_space<vmem>>, vector<1024x512xi8>
    %1 = arith.sitofp %0 : vector<1024x512xi8> to vector<1024x512xf32>
    %2 = arith.truncf %1 : vector<1024x512xf32> to vector<1024x512xbf16>
    %c0_1 = arith.constant 0 : index
    %c0_2 = arith.constant 0 : index
    %3 = vector.load %arg2[%c0_1, %c0_2] : memref<16x1024xbf16, #tpu.memory_space<vmem>>, vector<16x1024xbf16>
    %cst = arith.constant dense<0.000000e+00> : vector<16x512xf32>
    %4 = tpu.matmul %3, %2, %cst {dimension_numbers = #tpu.dot_dimension_numbers<[1], [0], [0], [1], [0, 0, 1, 1], [], []>} : vector<16x1024xbf16>, vector<1024x512xbf16>, vector<16x512xf32> -> vector<16x512xf32>
    %c0_3 = arith.constant 0 : index
    %c0_4 = arith.constant 0 : index
    %5 = vector.load %arg4[%c0_3, %c0_4] : memref<1x512xf32, #tpu.memory_space<vmem>>, vector<1x512xf32>
    %6 = vector.broadcast %5 : vector<1x512xf32> to vector<16x512xf32>
    %7 = arith.mulf %4, %6 : vector<16x512xf32>
    %c0_5 = arith.constant 0 : index
    %c0_6 = arith.constant 0 : index
    %8 = vector.load %arg5[%c0_5, %c0_6] : memref<1x512xf32, #tpu.memory_space<vmem>>, vector<1x512xf32>
    %9 = vector.broadcast %8 : vector<1x512xf32> to vector<16x512xf32>
    %10 = arith.addf %7, %9 : vector<16x512xf32>
    %c0_7 = arith.constant 0 : index
    %c0_8 = arith.constant 0 : index
    %11 = vector.load %arg6[%c0_7, %c0_8] : memref<16x512xf32, #tpu.memory_space<vmem>>, vector<16x512xf32>
    tpu.vector_store %arg6[%c0_7, %c0_8], %10 {strides = array<i32>} : memref<16x512xf32, #tpu.memory_space<vmem>>, vector<16x512xf32>,
    return
  }
  func.func @transform_0(%arg0: i32, %arg1: i32) -> (i32, i32) {
    %c0_i32 = arith.constant 0 : i32
    %c0_i32_0 = arith.constant 0 : i32
    return %arg1, %c0_i32 : i32, i32
  }
  func.func @transform_1(%arg0: i32, %arg1: i32) -> (i32, i32) {
    %c0_i32 = arith.constant 0 : i32
    %c0_i32_0 = arith.constant 0 : i32
    return %c0_i32, %arg0 : i32, i32
  }
  func.func @transform_2(%arg0: i32, %arg1: i32) -> (i32, i32) {
    %c0_i32 = arith.constant 0 : i32
    %c0_i32_0 = arith.constant 0 : i32
    return %c0_i32, %arg0 : i32, i32
  }
  func.func @transform_3(%arg0: i32, %arg1: i32) -> (i32, i32) {
    %c0_i32 = arith.constant 0 : i32
    %c0_i32_0 = arith.constant 0 : i32
    return %c0_i32, %arg0 : i32, i32
  }
  func.func @transform_4(%arg0: i32, %arg1: i32) -> (i32, i32) {
    %c0_i32 = arith.constant 0 : i32
    return %arg1, %arg0 : i32, i32
  }
}

</mosaic_0001>

<bundles_post_ra>
// kernel: adapter_matmul_bn.1
= control target key start
LH: loop header
LB: loop body
LE: loop exit
PB: predicated region body
PF: predicated region fallthrough
CT: control target
= control target key end

     0   :  { %9 = vsyncpa [#allocation3], 0  ;;  %s939_s15 = smov [#allocation2]   ;;  %s1065_s0 = inlined_call_operand.vmem [shape: bf16[16,1024], index: 0, kind: input, shape index: {}]   ;;  %s1066_s1 = inlined_call_operand.hbm [shape: s8[1024,512], index: 1, kind: input, shape index: {}]   ;;  %s1067_s2 = inlined_call_operand.vmem [shape: f32[1,512], index: 2, kind: input, shape index: {}]   ;;  %s1068_s3 = inlined_call_operand.vmem [shape: f32[1,512], index: 3, kind: input, shape index: {}]   ;;  %s1069_s4 = inlined_call_operand.vmem [shape: f32[16,512], index: 4, kind: output, shape index: {}]  }
   0x1   :  { %s17_s16 = sshll.u32 %s939_s15, 4  ;;  %s915_s19 = scalar_lea.hbm %s1066_s1, 16384  ;;  %s18_s16 = int_to_ptr.vmem [resolvable:$true] %s17_s16 }
   0x2   :  { %p916_p0 = scmp.ne.s32.totalorder %s1066_s1, %s915_s19  ;;  %p919_p1 = scmp.lt.u32.totalorder %s915_s19, %s1066_s1 }
   0x4   :  { %p921_p2 = pnand %p919_p1, %p916_p0 }
   0x6   :  { %924 = shalt.err (!%p921_p2)
}
   0x7   :  { %s925_s24 = scalar_lea.vmem %s18_s16, 16384  ;;  %p930_p4 = scmp.lt.s32.totalorder %s18_s16, %s18_s16 }
   0x8   :  { %p926_p3 = scmp.ne.s32.totalorder %s18_s16, %s925_s24  ;;  %p931_p5 = scmp.lt.s32.totalorder %s925_s24, %s925_s24 }
   0xa   :  { %p932_p6 = por %p931_p5, %p930_p4 }
   0xc   :  { %p933_p7 = pnand %p932_p6, %p926_p3 }
   0xe   :  { %936 = shalt.err (!%p933_p7)
}
   0xf   :  { %s940_s25 = smov 512   ;;  %s941_s26 = smov 32  }
  0x10   :  { %23 = dma.hbm_to_vmem [thread:$0]  %s1066_s1, 16384, %s18_s16, [#allocation3], %s940_s25, %s940_s25, %s941_s26  }
  0x11   :  { %937 = dma.done.wait [#allocation3], 16384  }
  0x12   :  { %938 = vsyncadd [#allocation3], 4294950912  ;;  %v32_v0 = vld [vmem:[#allocation2 + $0x8] sm:$0xff]  ;;  %v34_v1 = vld [vmem:[#allocation2 + $0x18] sm:$0xff] }
  0x13   :  { %v31_v2 = vld [vmem:[#allocation2] sm:$0xff]  ;;  %v160_v3 = vunpack.c.l.s8.bf16 %v32_v0  ;;  %v164_v4 = vunpack.c.h.s8.bf16 %v32_v0  ;;  %v162_v5 = vunpack.c.l.s8.bf16 %v34_v1  ;;  %v166_v6 = vunpack.c.h.s8.bf16 %v34_v1  ;;  %v33_v7 = vld [vmem:[#allocation2 + $0x10] sm:$0xff]  ;;  %v36_v10 = vld [vmem:[#allocation2 + $0x28] sm:$0xff] }
  0x14   :  { %v159_v8 = vunpack.c.l.s8.bf16 %v31_v2  ;;  %v161_v9 = vunpack.c.l.s8.bf16 %v33_v7  ;;  %v38_v11 = vld [vmem:[#allocation2 + $0x38] sm:$0xff]  ;;  %v163_v12 = vunpack.c.h.s8.bf16 %v31_v2  ;;  %v165_v13 = vunpack.c.h.s8.bf16 %v33_v7  ;;  %v35_v16 = vld [vmem:[#allocation2 + $0x20] sm:$0xff]  ;;  %v37_v17 = vld [vmem:[#allocation2 + $0x30] sm:$0xff] }
  0x15   :  { %463 = vmatprep.subr.bf16.mxu0 %v160_v3  ;;  %635 = vmatprep.subr.bf16.mxu1 %v162_v5  ;;  %v168_v14 = vunpack.c.l.s8.bf16 %v36_v10  ;;  %v170_v15 = vunpack.c.l.s8.bf16 %v38_v11  ;;  %v167_v18 = vunpack.c.l.s8.bf16 %v35_v16  ;;  %v169_v19 = vunpack.c.l.s8.bf16 %v37_v17  ;;  %v40_v22 = vld [vmem:[#allocation2 + $0x48] sm:$0xff]  ;;  %v42_v23 = vld [vmem:[#allocation2 + $0x58] sm:$0xff]  ;;  %v39_v28 = vld [vmem:[#allocation2 + $0x40] sm:$0xff] }
  0x16   :  { %464 = vmatpush1.bf16.msra.mxu0 %v159_v8  ;;  %636 = vmatpush1.bf16.msra.mxu1 %v161_v9  ;;  %v172_v20 = vunpack.c.h.s8.bf16 %v36_v10  ;;  %v174_v21 = vunpack.c.h.s8.bf16 %v38_v11  ;;  %v171_v24 = vunpack.c.h.s8.bf16 %v35_v16  ;;  %v173_v25 = vunpack.c.h.s8.bf16 %v37_v17  ;;  %v41_v29 = vld [vmem:[#allocation2 + $0x50] sm:$0xff]  ;;  %v982_v30 = vld [vmem:[%s1065_s0] sm:$0xff]  ;;  %v44_v37 = vld [vmem:[#allocation2 + $0x68] sm:$0xff] }
  0x17   :  { %465 = vmatprep.subr.bf16.mxu0 %v164_v4  ;;  %637 = vmatprep.subr.bf16.mxu1 %v166_v6  ;;  %v176_v26 = vunpack.c.l.s8.bf16 %v40_v22  ;;  %v178_v27 = vunpack.c.l.s8.bf16 %v42_v23  ;;  %v987_v31 = vld [vmem:[%s1065_s0 + $0x20] sm:$0xff]  ;;  %v175_v32 = vunpack.c.l.s8.bf16 %v39_v28  ;;  %v177_v33 = vunpack.c.l.s8.bf16 %v41_v29  ;;  %v46_v38 = vld [vmem:[#allocation2 + $0x78] sm:$0xff]  ;;  %v45_v44 = vld [vmem:[#allocation2 + $0x70] sm:$0xff] }
  0x18   :  { %v180_v34 = vunpack.c.h.s8.bf16 %v40_v22  ;;  %v182_v35 = vunpack.c.h.s8.bf16 %v42_v23  ;;  %v881_v36 = vcombine.high %v982_v30, %v987_v31  ;;  %v179_v39 = vunpack.c.h.s8.bf16 %v39_v28  ;;  %v43_v43 = vld [vmem:[#allocation2 + $0x60] sm:$0xff]  ;;  %v48_v49 = vld [vmem:[#allocation2 + $0x88] sm:$0xff]  ;;  %v50_v50 = vld [vmem:[#allocation2 + $0x98] sm:$0xff] }
  0x19   :  { %v181_v40 = vunpack.c.h.s8.bf16 %v41_v29  ;;  %v184_v41 = vunpack.c.l.s8.bf16 %v44_v37  ;;  %v186_v42 = vunpack.c.l.s8.bf16 %v46_v38  ;;  %v183_v45 = vunpack.c.l.s8.bf16 %v43_v43  ;;  %v47_v55 = vld [vmem:[#allocation2 + $0x80] sm:$0xff]  ;;  %v49_v56 = vld [vmem:[#allocation2 + $0x90] sm:$0xff]  ;;  %v52_v61 = vld [vmem:[#allocation2 + $0xa8] sm:$0xff] }
  0x1a   :  { %466 = vmatpush1.bf16.msra.mxu0 %v163_v12  ;;  %638 = vmatpush1.bf16.msra.mxu1 %v165_v13  ;;  %v185_v46 = vunpack.c.l.s8.bf16 %v45_v44  ;;  %v188_v47 = vunpack.c.h.s8.bf16 %v44_v37  ;;  %v190_v48 = vunpack.c.h.s8.bf16 %v46_v38  ;;  %v187_v51 = vunpack.c.h.s8.bf16 %v43_v43  ;;  %v54_v62 = vld [vmem:[#allocation2 + $0xb8] sm:$0xff]  ;;  %v51_v3 = vld [vmem:[#allocation2 + $0xa0] sm:$0xff]  ;;  %v53_v4 = vld [vmem:[#allocation2 + $0xb0] sm:$0xff] }
  0x1b   :  { %467 = vmatprep.subr.bf16.mxu0 %v168_v14  ;;  %639 = vmatprep.subr.bf16.mxu1 %v170_v15  ;;  %v189_v52 = vunpack.c.h.s8.bf16 %v45_v44  ;;  %v192_v53 = vunpack.c.l.s8.bf16 %v48_v49  ;;  %v194_v54 = vunpack.c.l.s8.bf16 %v50_v50  ;;  %v191_v57 = vunpack.c.l.s8.bf16 %v47_v55  ;;  %v56_v9 = vld [vmem:[#allocation2 + $0xc8] sm:$0xff]  ;;  %v58_v10 = vld [vmem:[#allocation2 + $0xd8] sm:$0xff]  ;;  %v55_v15 = vld [vmem:[#allocation2 + $0xc0] sm:$0xff] }
  0x1c   :  { %495 = vmatprep.mubr.bf16.mxu0 %v881_v36  ;;  %667 = vmatprep.mubr.bf16.mxu1 %v881_v36  ;;  %v193_v58 = vunpack.c.l.s8.bf16 %v49_v56  ;;  %v196_v59 = vunpack.c.h.s8.bf16 %v48_v49  ;;  %v198_v60 = vunpack.c.h.s8.bf16 %v50_v50  ;;  %v195_v63 = vunpack.c.h.s8.bf16 %v47_v55  ;;  %v57_v16 = vld [vmem:[#allocation2 + $0xd0] sm:$0xff]  ;;  %v62_v22 = vld [vmem:[#allocation2 + $0xf8] sm:$0xff]  ;;  %v996_v44 = vld [vmem:[%s1065_s0 + $0x8] sm:$0xff] }
  0x1d   :  { %v197_v0 = vunpack.c.h.s8.bf16 %v49_v56  ;;  %v200_v1 = vunpack.c.l.s8.bf16 %v52_v61  ;;  %v202_v2 = vunpack.c.l.s8.bf16 %v54_v62  ;;  %v199_v5 = vunpack.c.l.s8.bf16 %v51_v3  ;;  %v61_v28 = vld [vmem:[#allocation2 + $0xf0] sm:$0xff]  ;;  %v66_v36 = vld [vmem:[#allocation2 + $0x118] sm:$0xff]  ;;  %v68_v50 = vld [vmem:[#allocation2 + $0x128] sm:$0xff] }
  0x1e   :  { %468 = vmatpush1.bf16.msra.mxu0 %v167_v18  ;;  %640 = vmatpush1.bf16.msra.mxu1 %v169_v19  ;;  %v201_v6 = vunpack.c.l.s8.bf16 %v53_v4  ;;  %v204_v7 = vunpack.c.h.s8.bf16 %v52_v61  ;;  %v206_v8 = vunpack.c.h.s8.bf16 %v54_v62  ;;  %v203_v11 = vunpack.c.h.s8.bf16 %v51_v3  ;;  %v67_v55 = vld [vmem:[#allocation2 + $0x120] sm:$0xff]  ;;  %v69_v56 = vld [vmem:[#allocation2 + $0x130] sm:$0xff]  ;;  %v72_v61 = vld [vmem:[#allocation2 + $0x148] sm:$0xff] }
  0x1f   :  { %469 = vmatprep.subr.bf16.mxu0 %v172_v20  ;;  %641 = vmatprep.subr.bf16.mxu1 %v174_v21  ;;  %v205_v12 = vunpack.c.h.s8.bf16 %v53_v4  ;;  %v208_v13 = vunpack.c.l.s8.bf16 %v56_v9  ;;  %v210_v14 = vunpack.c.l.s8.bf16 %v58_v10  ;;  %v207_v17 = vunpack.c.l.s8.bf16 %v55_v15  ;;  %v60_v21 = vld [vmem:[#allocation2 + $0xe8] sm:$0xff]  ;;  %v74_v62 = vld [vmem:[#allocation2 + $0x158] sm:$0xff]  ;;  %v71_v3 = vld [vmem:[#allocation2 + $0x140] sm:$0xff] }
  0x20   :  { %v209_v18 = vunpack.c.l.s8.bf16 %v57_v16  ;;  %v212_v19 = vunpack.c.h.s8.bf16 %v56_v9  ;;  %v214_v20 = vunpack.c.h.s8.bf16 %v58_v10  ;;  %v211_v23 = vunpack.c.h.s8.bf16 %v55_v15  ;;  %v73_v4 = vld [vmem:[#allocation2 + $0x150] sm:$0xff]  ;;  %v76_v9 = vld [vmem:[#allocation2 + $0x168] sm:$0xff]  ;;  %v78_v10 = vld [vmem:[#allocation2 + $0x178] sm:$0xff] }
  0x21   :  { %v221_v38 = vunpack.c.h.s8.bf16 %v61_v28  ;;  %v880_v43 = vcombine.low %v982_v30, %v987_v31  ;;  %v230_v49 = vunpack.c.h.s8.bf16 %v66_v36  ;;  %v70_v30 = vld [vmem:[#allocation2 + $0x138] sm:$0xff]  ;;  %v75_v15 = vld [vmem:[#allocation2 + $0x160] sm:$0xff] }
  0x22   :  { %470 = vmatpush1.bf16.msra.mxu0 %v171_v24  ;;  %642 = vmatpush1.bf16.msra.mxu1 %v173_v25  ;;  %v213_v24 = vunpack.c.h.s8.bf16 %v57_v16  ;;  %v216_v25 = vunpack.c.l.s8.bf16 %v60_v21  ;;  %v77_v16 = vld [vmem:[#allocation2 + $0x170] sm:$0xff] }
  0x23   :  { %471 = vmatprep.subr.bf16.mxu0 %v176_v26  ;;  %643 = vmatprep.subr.bf16.mxu1 %v178_v27  ;;  %v218_v26 = vunpack.c.l.s8.bf16 %v62_v22  ;;  %v59_v27 = vld [vmem:[#allocation2 + $0xe0] sm:$0xff] }
  0x24   :  { %v215_v29 = vunpack.c.l.s8.bf16 %v59_v27  ;;  %v219_v37 = vunpack.c.h.s8.bf16 %v59_v27  ;;  %v79_v27 = vld [vmem:[#allocation2 + $0x180] sm:$0xff] }
  0x26   :  { %472 = vmatpush1.bf16.msra.mxu0 %v175_v32  ;;  %644 = vmatpush1.bf16.msra.mxu1 %v177_v33  ;;  %v217_v32 = vunpack.c.l.s8.bf16 %v61_v28  ;;  %v220_v33 = vunpack.c.h.s8.bf16 %v60_v21  ;;  %v80_v21 = vld [vmem:[#allocation2 + $0x188] sm:$0xff]  ;;  %v81_v28 = vld [vmem:[#allocation2 + $0x190] sm:$0xff] }
  0x27   :  { %473 = vmatprep.subr.bf16.mxu0 %v180_v34  ;;  %645 = vmatprep.subr.bf16.mxu1 %v182_v35  ;;  %v222_v34 = vunpack.c.h.s8.bf16 %v62_v22  ;;  %v64_v35 = vld [vmem:[#allocation2 + $0x108] sm:$0xff]  ;;  %v82_v22 = vld [vmem:[#allocation2 + $0x198] sm:$0xff] }
  0x2a   :  { %474 = vmatpush1.bf16.msra.mxu0 %v179_v39  ;;  %646 = vmatpush1.bf16.msra.mxu1 %v181_v40  ;;  %v224_v39 = vunpack.c.l.s8.bf16 %v64_v35  ;;  %v226_v40 = vunpack.c.l.s8.bf16 %v66_v36  ;;  %v86_v36 = vld [vmem:[#allocation2 + $0x1b8] sm:$0xff] }
  0x2b   :  { %475 = vmatprep.subr.bf16.mxu0 %v184_v41  ;;  %647 = vmatprep.subr.bf16.mxu1 %v186_v42  ;;  %v63_v41 = vld [vmem:[#allocation2 + $0x100] sm:$0xff]  ;;  %v65_v42 = vld [vmem:[#allocation2 + $0x110] sm:$0xff] }
  0x2e   :  { %476 = vmatpush1.bf16.msra.mxu0 %v183_v45  ;;  %648 = vmatpush1.bf16.msra.mxu1 %v185_v46  ;;  %v1001_v45 = vld [vmem:[%s1065_s0 + $0x28] sm:$0xff]  ;;  %v223_v46 = vunpack.c.l.s8.bf16 %v63_v41 }
  0x2f   :  { %477 = vmatprep.subr.bf16.mxu0 %v188_v47  ;;  %649 = vmatprep.subr.bf16.mxu1 %v190_v48  ;;  %v225_v47 = vunpack.c.l.s8.bf16 %v65_v42  ;;  %v228_v48 = vunpack.c.h.s8.bf16 %v64_v35  ;;  %v883_v31 = vcombine.high %v996_v44, %v1001_v45  ;;  %v84_v35 = vld [vmem:[#allocation2 + $0x1a8] sm:$0xff] }
  0x32   :  { %478 = vmatpush1.bf16.msra.mxu0 %v187_v51  ;;  %650 = vmatpush1.bf16.msra.mxu1 %v189_v52  ;;  %v227_v51 = vunpack.c.h.s8.bf16 %v63_v41  ;;  %v229_v52 = vunpack.c.h.s8.bf16 %v65_v42  ;;  %v83_v41 = vld [vmem:[#allocation2 + $0x1a0] sm:$0xff]  ;;  %v85_v42 = vld [vmem:[#allocation2 + $0x1b0] sm:$0xff] }
  0x33   :  { %479 = vmatprep.subr.bf16.mxu0 %v192_v53  ;;  %651 = vmatprep.subr.bf16.mxu1 %v194_v54  ;;  %v232_v53 = vunpack.c.l.s8.bf16 %v68_v50  ;;  %v234_v54 = vunpack.c.l.s8.bf16 %v70_v30 }
  0x36   :  { %480 = vmatpush1.bf16.msra.mxu0 %v191_v57  ;;  %652 = vmatpush1.bf16.msra.mxu1 %v193_v58  ;;  %v231_v57 = vunpack.c.l.s8.bf16 %v67_v55  ;;  %v233_v58 = vunpack.c.l.s8.bf16 %v69_v56 }
  0x37   :  { %481 = vmatprep.subr.bf16.mxu0 %v196_v59  ;;  %653 = vmatprep.subr.bf16.mxu1 %v198_v60  ;;  %v236_v59 = vunpack.c.h.s8.bf16 %v68_v50  ;;  %v238_v60 = vunpack.c.h.s8.bf16 %v70_v30  ;;  %v90_v50 = vld [vmem:[#allocation2 + $0x1d8] sm:$0xff]  ;;  %v267_v30 = vunpack.c.h.s8.bf16 %v83_v41 }
  0x3a   :  { %482 = vmatpush1.bf16.msra.mxu0 %v195_v63  ;;  %654 = vmatpush1.bf16.msra.mxu1 %v197_v0  ;;  %v235_v63 = vunpack.c.h.s8.bf16 %v67_v55  ;;  %v237_v0 = vunpack.c.h.s8.bf16 %v69_v56 }
  0x3b   :  { %483 = vmatprep.subr.bf16.mxu0 %v200_v1  ;;  %655 = vmatprep.subr.bf16.mxu1 %v202_v2  ;;  %v240_v1 = vunpack.c.l.s8.bf16 %v72_v61  ;;  %v242_v2 = vunpack.c.l.s8.bf16 %v74_v62 }
  0x3e   :  { %484 = vmatpush1.bf16.msra.mxu0 %v199_v5  ;;  %656 = vmatpush1.bf16.msra.mxu1 %v201_v6  ;;  %v239_v5 = vunpack.c.l.s8.bf16 %v71_v3  ;;  %v241_v6 = vunpack.c.l.s8.bf16 %v73_v4 }
  0x3f   :  { %485 = vmatprep.subr.bf16.mxu0 %v204_v7  ;;  %657 = vmatprep.subr.bf16.mxu1 %v206_v8  ;;  %v244_v7 = vunpack.c.h.s8.bf16 %v72_v61  ;;  %v246_v8 = vunpack.c.h.s8.bf16 %v74_v62 }
  0x42   :  { %486 = vmatpush1.bf16.msra.mxu0 %v203_v11  ;;  %658 = vmatpush1.bf16.msra.mxu1 %v205_v12  ;;  %v243_v11 = vunpack.c.h.s8.bf16 %v71_v3  ;;  %v245_v12 = vunpack.c.h.s8.bf16 %v73_v4 }
  0x43   :  { %487 = vmatprep.subr.bf16.mxu0 %v208_v13  ;;  %659 = vmatprep.subr.bf16.mxu1 %v210_v14  ;;  %v248_v13 = vunpack.c.l.s8.bf16 %v76_v9  ;;  %v250_v14 = vunpack.c.l.s8.bf16 %v78_v10 }
  0x46   :  { %488 = vmatpush1.bf16.msra.mxu0 %v207_v17  ;;  %660 = vmatpush1.bf16.msra.mxu1 %v209_v18  ;;  %v247_v17 = vunpack.c.l.s8.bf16 %v75_v15  ;;  %v249_v18 = vunpack.c.l.s8.bf16 %v77_v16 }
  0x47   :  { %489 = vmatprep.subr.bf16.mxu0 %v212_v19  ;;  %661 = vmatprep.subr.bf16.mxu1 %v214_v20  ;;  %v252_v19 = vunpack.c.h.s8.bf16 %v76_v9  ;;  %v254_v20 = vunpack.c.h.s8.bf16 %v78_v10 }
  0x4a   :  { %490 = vmatpush1.bf16.msra.mxu0 %v211_v23  ;;  %662 = vmatpush1.bf16.msra.mxu1 %v213_v24  ;;  %v251_v23 = vunpack.c.h.s8.bf16 %v75_v15  ;;  %v253_v24 = vunpack.c.h.s8.bf16 %v77_v16  ;;  %v882_v15 = vcombine.low %v996_v44, %v1001_v45  ;;  %v1010_v16 = vld [vmem:[%s1065_s0 + $0x10] sm:$0xff]  ;;  %v102_v44 = vld [vmem:[#allocation2 + $0x238] sm:$0xff] }
  0x4b   :  { %491 = vmatprep.subr.bf16.mxu0 %v216_v25  ;;  %663 = vmatprep.subr.bf16.mxu1 %v218_v26  ;;  %v256_v25 = vunpack.c.l.s8.bf16 %v80_v21  ;;  %v258_v26 = vunpack.c.l.s8.bf16 %v82_v22 }
  0x4e   :  { %492 = vmatpush1.bf16.msra.mxu0 %v215_v29  ;;  %664 = vmatpush1.bf16.msra.mxu1 %v217_v32  ;;  %v255_v29 = vunpack.c.l.s8.bf16 %v79_v27  ;;  %v257_v32 = vunpack.c.l.s8.bf16 %v81_v28 }
  0x4f   :  { %493 = vmatprep.subr.bf16.mxu0 %v220_v33  ;;  %665 = vmatprep.subr.bf16.mxu1 %v222_v34  ;;  %v260_v33 = vunpack.c.h.s8.bf16 %v80_v21  ;;  %v262_v34 = vunpack.c.h.s8.bf16 %v82_v22  ;;  %v100_v22 = vld [vmem:[#allocation2 + $0x228] sm:$0xff] }
  0x52   :  { %494 = vmatpush1.bf16.msra.mxu0 %v219_v37  ;;  %666 = vmatpush1.bf16.msra.mxu1 %v221_v38  ;;  %v259_v37 = vunpack.c.h.s8.bf16 %v79_v27  ;;  %v261_v38 = vunpack.c.h.s8.bf16 %v81_v28  ;;  %v99_v27 = vld [vmem:[#allocation2 + $0x220] sm:$0xff]  ;;  %v101_v28 = vld [vmem:[#allocation2 + $0x230] sm:$0xff] }
  0x53   :  { %506 = vmatprep.subr.bf16.mxu0 %v224_v39  ;;  %678 = vmatprep.subr.bf16.mxu1 %v226_v40  ;;  %v264_v39 = vunpack.c.l.s8.bf16 %v84_v35  ;;  %v266_v40 = vunpack.c.l.s8.bf16 %v86_v36 }
  0x55   :  { %496 = vmatmul.mubr.bf16.vlgmr.msra.gmra.mrb[0].mxu0 %v880_v43  ;;  %668 = vmatmul.mubr.bf16.vlgmr.msra.gmra.mrb[0].mxu1 %v880_v43  ;;  %v263_v43 = vunpack.c.l.s8.bf16 %v83_v41  ;;  %v103_v41 = vld [vmem:[#allocation2 + $0x240] sm:$0xff] }
  0x56   :  { %507 = vmatpush1.bf16.msra.mxu0 %v223_v46  ;;  %679 = vmatpush1.bf16.msra.mxu1 %v225_v47  ;;  %v265_v46 = vunpack.c.l.s8.bf16 %v85_v42  ;;  %v268_v47 = vunpack.c.h.s8.bf16 %v84_v35  ;;  %v104_v35 = vld [vmem:[#allocation2 + $0x248] sm:$0xff] }
  0x57   :  { %508 = vmatprep.subr.bf16.mxu0 %v228_v48  ;;  %680 = vmatprep.subr.bf16.mxu1 %v230_v49  ;;  %v270_v48 = vunpack.c.h.s8.bf16 %v86_v36  ;;  %v88_v49 = vld [vmem:[#allocation2 + $0x1c8] sm:$0xff]  ;;  %v106_v36 = vld [vmem:[#allocation2 + $0x258] sm:$0xff] }
  0x58   :  { %538 = vmatprep.mubr.bf16.mxu0 %v883_v31  ;;  %710 = vmatprep.mubr.bf16.mxu1 %v883_v31  ;;  %v269_v31 = vunpack.c.h.s8.bf16 %v85_v42  ;;  %v105_v42 = vld [vmem:[#allocation2 + $0x250] sm:$0xff] }
  0x5a   :  { %509 = vmatpush1.bf16.msra.mxu0 %v227_v51  ;;  %681 = vmatpush1.bf16.msra.mxu1 %v229_v52  ;;  %v272_v51 = vunpack.c.l.s8.bf16 %v88_v49  ;;  %v274_v52 = vunpack.c.l.s8.bf16 %v90_v50 }
  0x5b   :  { %510 = vmatprep.subr.bf16.mxu0 %v232_v53  ;;  %682 = vmatprep.subr.bf16.mxu1 %v234_v54  ;;  %v87_v53 = vld [vmem:[#allocation2 + $0x1c0] sm:$0xff]  ;;  %v89_v54 = vld [vmem:[#allocation2 + $0x1d0] sm:$0xff] }
  0x5c   :  { %v271_v55 = vunpack.c.l.s8.bf16 %v87_v53  ;;  %v273_v56 = vunpack.c.l.s8.bf16 %v89_v54  ;;  %v275_v61 = vunpack.c.h.s8.bf16 %v87_v53  ;;  %v277_v62 = vunpack.c.h.s8.bf16 %v89_v54  ;;  %v107_v53 = vld [vmem:[#allocation2 + $0x260] sm:$0xff]  ;;  %v109_v54 = vld [vmem:[#allocation2 + $0x270] sm:$0xff] }
  0x5e   :  { %511 = vmatpush1.bf16.msra.mxu0 %v231_v57  ;;  %683 = vmatpush1.bf16.msra.mxu1 %v233_v58  ;;  %v276_v57 = vunpack.c.h.s8.bf16 %v88_v49  ;;  %v278_v58 = vunpack.c.h.s8.bf16 %v90_v50  ;;  %v108_v49 = vld [vmem:[#allocation2 + $0x268] sm:$0xff]  ;;  %v110_v50 = vld [vmem:[#allocation2 + $0x278] sm:$0xff] }
  0x5f   :  { %512 = vmatprep.subr.bf16.mxu0 %v236_v59  ;;  %684 = vmatprep.subr.bf16.mxu1 %v238_v60  ;;  %v92_v59 = vld [vmem:[#allocation2 + $0x1e8] sm:$0xff]  ;;  %v94_v60 = vld [vmem:[#allocation2 + $0x1f8] sm:$0xff] }
  0x62   :  { %513 = vmatpush1.bf16.msra.mxu0 %v235_v63  ;;  %685 = vmatpush1.bf16.msra.mxu1 %v237_v0  ;;  %v280_v63 = vunpack.c.l.s8.bf16 %v92_v59  ;;  %v282_v0 = vunpack.c.l.s8.bf16 %v94_v60 }
  0x63   :  { %514 = vmatprep.subr.bf16.mxu0 %v240_v1  ;;  %686 = vmatprep.subr.bf16.mxu1 %v242_v2  ;;  %v91_v1 = vld [vmem:[#allocation2 + $0x1e0] sm:$0xff]  ;;  %v93_v2 = vld [vmem:[#allocation2 + $0x1f0] sm:$0xff] }
  0x64   :  { %v279_v3 = vunpack.c.l.s8.bf16 %v91_v1  ;;  %v281_v4 = vunpack.c.l.s8.bf16 %v93_v2  ;;  %v283_v9 = vunpack.c.h.s8.bf16 %v91_v1  ;;  %v285_v10 = vunpack.c.h.s8.bf16 %v93_v2  ;;  %v111_v1 = vld [vmem:[#allocation2 + $0x280] sm:$0xff]  ;;  %v113_v2 = vld [vmem:[#allocation2 + $0x290] sm:$0xff] }
  0x66   :  { %515 = vmatpush1.bf16.msra.mxu0 %v239_v5  ;;  %687 = vmatpush1.bf16.msra.mxu1 %v241_v6  ;;  %v284_v5 = vunpack.c.h.s8.bf16 %v92_v59  ;;  %v286_v6 = vunpack.c.h.s8.bf16 %v94_v60  ;;  %v112_v59 = vld [vmem:[#allocation2 + $0x288] sm:$0xff]  ;;  %v114_v60 = vld [vmem:[#allocation2 + $0x298] sm:$0xff] }
  0x67   :  { %516 = vmatprep.subr.bf16.mxu0 %v244_v7  ;;  %688 = vmatprep.subr.bf16.mxu1 %v246_v8  ;;  %v96_v7 = vld [vmem:[#allocation2 + $0x208] sm:$0xff]  ;;  %v98_v8 = vld [vmem:[#allocation2 + $0x218] sm:$0xff] }
  0x68   :  { %v294_v21 = vunpack.c.h.s8.bf16 %v98_v8 }
  0x6a   :  { %517 = vmatpush1.bf16.msra.mxu0 %v243_v11  ;;  %689 = vmatpush1.bf16.msra.mxu1 %v245_v12  ;;  %v288_v11 = vunpack.c.l.s8.bf16 %v96_v7  ;;  %v290_v12 = vunpack.c.l.s8.bf16 %v98_v8  ;;  %v118_v8 = vld [vmem:[#allocation2 + $0x2b8] sm:$0xff] }
  0x6b   :  { %518 = vmatprep.subr.bf16.mxu0 %v248_v13  ;;  %690 = vmatprep.subr.bf16.mxu1 %v250_v14  ;;  %v95_v13 = vld [vmem:[#allocation2 + $0x200] sm:$0xff]  ;;  %v97_v14 = vld [vmem:[#allocation2 + $0x210] sm:$0xff] }
  0x6e   :  { %519 = vmatpush1.bf16.msra.mxu0 %v247_v17  ;;  %691 = vmatpush1.bf16.msra.mxu1 %v249_v18  ;;  %v1015_v17 = vld [vmem:[%s1065_s0 + $0x30] sm:$0xff]  ;;  %v287_v18 = vunpack.c.l.s8.bf16 %v95_v13 }
  0x6f   :  { %520 = vmatprep.subr.bf16.mxu0 %v252_v19  ;;  %692 = vmatprep.subr.bf16.mxu1 %v254_v20  ;;  %v289_v19 = vunpack.c.l.s8.bf16 %v97_v14  ;;  %v292_v20 = vunpack.c.h.s8.bf16 %v96_v7  ;;  %v885_v45 = vcombine.high %v1010_v16, %v1015_v17  ;;  %v116_v7 = vld [vmem:[#allocation2 + $0x2a8] sm:$0xff] }
  0x72   :  { %521 = vmatpush1.bf16.msra.mxu0 %v251_v23  ;;  %693 = vmatpush1.bf16.msra.mxu1 %v253_v24  ;;  %v291_v23 = vunpack.c.h.s8.bf16 %v95_v13  ;;  %v293_v24 = vunpack.c.h.s8.bf16 %v97_v14  ;;  %v115_v13 = vld [vmem:[#allocation2 + $0x2a0] sm:$0xff]  ;;  %v117_v14 = vld [vmem:[#allocation2 + $0x2b0] sm:$0xff] }
  0x73   :  { %522 = vmatprep.subr.bf16.mxu0 %v256_v25  ;;  %694 = vmatprep.subr.bf16.mxu1 %v258_v26  ;;  %v296_v25 = vunpack.c.l.s8.bf16 %v100_v22  ;;  %v298_v26 = vunpack.c.l.s8.bf16 %v102_v44 }
  0x76   :  { %523 = vmatpush1.bf16.msra.mxu0 %v255_v29  ;;  %695 = vmatpush1.bf16.msra.mxu1 %v257_v32  ;;  %v295_v29 = vunpack.c.l.s8.bf16 %v99_v27  ;;  %v297_v32 = vunpack.c.l.s8.bf16 %v101_v28 }
  0x77   :  { %524 = vmatprep.subr.bf16.mxu0 %v260_v33  ;;  %696 = vmatprep.subr.bf16.mxu1 %v262_v34  ;;  %v300_v33 = vunpack.c.h.s8.bf16 %v100_v22  ;;  %v302_v34 = vunpack.c.h.s8.bf16 %v102_v44  ;;  %v122_v22 = vld [vmem:[#allocation2 + $0x2d8] sm:$0xff]  ;;  %v331_v44 = vunpack.c.h.s8.bf16 %v115_v13 }
  0x7a   :  { %525 = vmatpush1.bf16.msra.mxu0 %v259_v37  ;;  %697 = vmatpush1.bf16.msra.mxu1 %v261_v38  ;;  %v299_v37 = vunpack.c.h.s8.bf16 %v99_v27  ;;  %v301_v38 = vunpack.c.h.s8.bf16 %v101_v28 }
  0x7b   :  { %526 = vmatprep.subr.bf16.mxu0 %v264_v39  ;;  %698 = vmatprep.subr.bf16.mxu1 %v266_v40  ;;  %v304_v39 = vunpack.c.l.s8.bf16 %v104_v35  ;;  %v306_v40 = vunpack.c.l.s8.bf16 %v106_v36 }
  0x7e   :  { %527 = vmatpush1.bf16.msra.mxu0 %v263_v43  ;;  %699 = vmatpush1.bf16.msra.mxu1 %v265_v46  ;;  %v303_v43 = vunpack.c.l.s8.bf16 %v103_v41  ;;  %v305_v46 = vunpack.c.l.s8.bf16 %v105_v42 }
  0x7f   :  { %528 = vmatprep.subr.bf16.mxu0 %v268_v47  ;;  %700 = vmatprep.subr.bf16.mxu1 %v270_v48  ;;  %v308_v47 = vunpack.c.h.s8.bf16 %v104_v35  ;;  %v310_v48 = vunpack.c.h.s8.bf16 %v106_v36 }
  0x82   :  { %529 = vmatpush1.bf16.msra.mxu0 %v267_v30  ;;  %701 = vmatpush1.bf16.msra.mxu1 %v269_v31  ;;  %v307_v30 = vunpack.c.h.s8.bf16 %v103_v41  ;;  %v309_v31 = vunpack.c.h.s8.bf16 %v105_v42 }
  0x83   :  { %530 = vmatprep.subr.bf16.mxu0 %v272_v51  ;;  %702 = vmatprep.subr.bf16.mxu1 %v274_v52  ;;  %v312_v51 = vunpack.c.l.s8.bf16 %v108_v49  ;;  %v314_v52 = vunpack.c.l.s8.bf16 %v110_v50 }
  0x86   :  { %531 = vmatpush1.bf16.msra.mxu0 %v271_v55  ;;  %703 = vmatpush1.bf16.msra.mxu1 %v273_v56  ;;  %v311_v55 = vunpack.c.l.s8.bf16 %v107_v53  ;;  %v313_v56 = vunpack.c.l.s8.bf16 %v109_v54 }
  0x87   :  { %532 = vmatprep.subr.bf16.mxu0 %v276_v57  ;;  %704 = vmatprep.subr.bf16.mxu1 %v278_v58  ;;  %v316_v57 = vunpack.c.h.s8.bf16 %v108_v49  ;;  %v318_v58 = vunpack.c.h.s8.bf16 %v110_v50 }
  0x8a   :  { %533 = vmatpush1.bf16.msra.mxu0 %v275_v61  ;;  %705 = vmatpush1.bf16.msra.mxu1 %v277_v62  ;;  %v315_v61 = vunpack.c.h.s8.bf16 %v107_v53  ;;  %v317_v62 = vunpack.c.h.s8.bf16 %v109_v54  ;;  %v884_v53 = vcombine.low %v1010_v16, %v1015_v17  ;;  %v1024_v54 = vld [vmem:[%s1065_s0 + $0x18] sm:$0xff] }
  0x8b   :  { %534 = vmatprep.subr.bf16.mxu0 %v280_v63  ;;  %706 = vmatprep.subr.bf16.mxu1 %v282_v0  ;;  %v320_v63 = vunpack.c.l.s8.bf16 %v112_v59  ;;  %v322_v0 = vunpack.c.l.s8.bf16 %v114_v60  ;;  %v134_v16 = vld [vmem:[#allocation2 + $0x338] sm:$0xff] }
  0x8e   :  { %535 = vmatpush1.bf16.msra.mxu0 %v279_v3  ;;  %707 = vmatpush1.bf16.msra.mxu1 %v281_v4  ;;  %v319_v3 = vunpack.c.l.s8.bf16 %v111_v1  ;;  %v321_v4 = vunpack.c.l.s8.bf16 %v113_v2 }
  0x8f   :  { %536 = vmatprep.subr.bf16.mxu0 %v284_v5  ;;  %708 = vmatprep.subr.bf16.mxu1 %v286_v6  ;;  %v324_v5 = vunpack.c.h.s8.bf16 %v112_v59  ;;  %v326_v6 = vunpack.c.h.s8.bf16 %v114_v60  ;;  %v132_v60 = vld [vmem:[#allocation2 + $0x328] sm:$0xff] }
  0x92   :  { %537 = vmatpush1.bf16.msra.mxu0 %v283_v9  ;;  %709 = vmatpush1.bf16.msra.mxu1 %v285_v10  ;;  %v323_v9 = vunpack.c.h.s8.bf16 %v111_v1  ;;  %v325_v10 = vunpack.c.h.s8.bf16 %v113_v2  ;;  %v131_v1 = vld [vmem:[#allocation2 + $0x320] sm:$0xff]  ;;  %v133_v2 = vld [vmem:[#allocation2 + $0x330] sm:$0xff] }
  0x93   :  { %549 = vmatprep.subr.bf16.mxu0 %v288_v11  ;;  %721 = vmatprep.subr.bf16.mxu1 %v290_v12  ;;  %v328_v11 = vunpack.c.l.s8.bf16 %v116_v7  ;;  %v330_v12 = vunpack.c.l.s8.bf16 %v118_v8 }
  0x95   :  { %539 = vmatmul.mubr.bf16.vlgmr.msra.gmra.mrb[0].mxu0 %v882_v15  ;;  %711 = vmatmul.mubr.bf16.vlgmr.msra.gmra.mrb[0].mxu1 %v882_v15  ;;  %v327_v15 = vunpack.c.l.s8.bf16 %v115_v13  ;;  %v135_v13 = vld [vmem:[#allocation2 + $0x340] sm:$0xff] }
  0x96   :  { %550 = vmatpush1.bf16.msra.mxu0 %v287_v18  ;;  %722 = vmatpush1.bf16.msra.mxu1 %v289_v19  ;;  %v329_v18 = vunpack.c.l.s8.bf16 %v117_v14  ;;  %v332_v19 = vunpack.c.h.s8.bf16 %v116_v7  ;;  %v136_v7 = vld [vmem:[#allocation2 + $0x348] sm:$0xff] }
  0x97   :  { %551 = vmatprep.subr.bf16.mxu0 %v292_v20  ;;  %723 = vmatprep.subr.bf16.mxu1 %v294_v21  ;;  %v334_v20 = vunpack.c.h.s8.bf16 %v118_v8  ;;  %v120_v21 = vld [vmem:[#allocation2 + $0x2c8] sm:$0xff]  ;;  %v138_v8 = vld [vmem:[#allocation2 + $0x358] sm:$0xff] }
  0x98   :  { %581 = vmatprep.mubr.bf16.mxu0 %v885_v45  ;;  %753 = vmatprep.mubr.bf16.mxu1 %v885_v45  ;;  %v333_v45 = vunpack.c.h.s8.bf16 %v117_v14  ;;  %v137_v14 = vld [vmem:[#allocation2 + $0x350] sm:$0xff] }
  0x9a   :  { %552 = vmatpush1.bf16.msra.mxu0 %v291_v23  ;;  %724 = vmatpush1.bf16.msra.mxu1 %v293_v24  ;;  %v336_v23 = vunpack.c.l.s8.bf16 %v120_v21  ;;  %v338_v24 = vunpack.c.l.s8.bf16 %v122_v22 }
  0x9b   :  { %553 = vmatprep.subr.bf16.mxu0 %v296_v25  ;;  %725 = vmatprep.subr.bf16.mxu1 %v298_v26  ;;  %v119_v25 = vld [vmem:[#allocation2 + $0x2c0] sm:$0xff]  ;;  %v121_v26 = vld [vmem:[#allocation2 + $0x2d0] sm:$0xff] }
  0x9c   :  { %v335_v27 = vunpack.c.l.s8.bf16 %v119_v25  ;;  %v337_v28 = vunpack.c.l.s8.bf16 %v121_v26  ;;  %v339_v35 = vunpack.c.h.s8.bf16 %v119_v25  ;;  %v341_v36 = vunpack.c.h.s8.bf16 %v121_v26  ;;  %v139_v25 = vld [vmem:[#allocation2 + $0x360] sm:$0xff]  ;;  %v141_v26 = vld [vmem:[#allocation2 + $0x370] sm:$0xff] }
  0x9e   :  { %554 = vmatpush1.bf16.msra.mxu0 %v295_v29  ;;  %726 = vmatpush1.bf16.msra.mxu1 %v297_v32  ;;  %v340_v29 = vunpack.c.h.s8.bf16 %v120_v21  ;;  %v342_v32 = vunpack.c.h.s8.bf16 %v122_v22  ;;  %v140_v21 = vld [vmem:[#allocation2 + $0x368] sm:$0xff]  ;;  %v142_v22 = vld [vmem:[#allocation2 + $0x378] sm:$0xff] }
  0x9f   :  { %555 = vmatprep.subr.bf16.mxu0 %v300_v33  ;;  %727 = vmatprep.subr.bf16.mxu1 %v302_v34  ;;  %v124_v33 = vld [vmem:[#allocation2 + $0x2e8] sm:$0xff]  ;;  %v126_v34 = vld [vmem:[#allocation2 + $0x2f8] sm:$0xff] }
  0xa2   :  { %556 = vmatpush1.bf16.msra.mxu0 %v299_v37  ;;  %728 = vmatpush1.bf16.msra.mxu1 %v301_v38  ;;  %v344_v37 = vunpack.c.l.s8.bf16 %v124_v33  ;;  %v346_v38 = vunpack.c.l.s8.bf16 %v126_v34 }
  0xa3   :  { %557 = vmatprep.subr.bf16.mxu0 %v304_v39  ;;  %729 = vmatprep.subr.bf16.mxu1 %v306_v40  ;;  %v123_v39 = vld [vmem:[#allocation2 + $0x2e0] sm:$0xff]  ;;  %v125_v40 = vld [vmem:[#allocation2 + $0x2f0] sm:$0xff] }
  0xa4   :  { %v343_v41 = vunpack.c.l.s8.bf16 %v123_v39  ;;  %v345_v42 = vunpack.c.l.s8.bf16 %v125_v40  ;;  %v347_v49 = vunpack.c.h.s8.bf16 %v123_v39  ;;  %v349_v50 = vunpack.c.h.s8.bf16 %v125_v40  ;;  %v143_v39 = vld [vmem:[#allocation2 + $0x380] sm:$0xff]  ;;  %v145_v40 = vld [vmem:[#allocation2 + $0x390] sm:$0xff] }
  0xa6   :  { %558 = vmatpush1.bf16.msra.mxu0 %v303_v43  ;;  %730 = vmatpush1.bf16.msra.mxu1 %v305_v46  ;;  %v348_v43 = vunpack.c.h.s8.bf16 %v124_v33  ;;  %v350_v46 = vunpack.c.h.s8.bf16 %v126_v34  ;;  %v144_v33 = vld [vmem:[#allocation2 + $0x388] sm:$0xff]  ;;  %v146_v34 = vld [vmem:[#allocation2 + $0x398] sm:$0xff] }
  0xa7   :  { %559 = vmatprep.subr.bf16.mxu0 %v308_v47  ;;  %731 = vmatprep.subr.bf16.mxu1 %v310_v48  ;;  %v128_v47 = vld [vmem:[#allocation2 + $0x308] sm:$0xff]  ;;  %v130_v48 = vld [vmem:[#allocation2 + $0x318] sm:$0xff] }
  0xa8   :  { %v358_v59 = vunpack.c.h.s8.bf16 %v130_v48 }
  0xaa   :  { %560 = vmatpush1.bf16.msra.mxu0 %v307_v30  ;;  %732 = vmatpush1.bf16.msra.mxu1 %v309_v31  ;;  %v352_v30 = vunpack.c.l.s8.bf16 %v128_v47  ;;  %v354_v31 = vunpack.c.l.s8.bf16 %v130_v48  ;;  %v150_v48 = vld [vmem:[#allocation2 + $0x3b8] sm:$0xff] }
  0xab   :  { %561 = vmatprep.subr.bf16.mxu0 %v312_v51  ;;  %733 = vmatprep.subr.bf16.mxu1 %v314_v52  ;;  %v127_v51 = vld [vmem:[#allocation2 + $0x300] sm:$0xff]  ;;  %v129_v52 = vld [vmem:[#allocation2 + $0x310] sm:$0xff] }
  0xae   :  { %562 = vmatpush1.bf16.msra.mxu0 %v311_v55  ;;  %734 = vmatpush1.bf16.msra.mxu1 %v313_v56  ;;  %v1029_v55 = vld [vmem:[%s1065_s0 + $0x38] sm:$0xff]  ;;  %v351_v56 = vunpack.c.l.s8.bf16 %v127_v51 }
  0xaf   :  { %563 = vmatprep.subr.bf16.mxu0 %v316_v57  ;;  %735 = vmatprep.subr.bf16.mxu1 %v318_v58  ;;  %v353_v57 = vunpack.c.l.s8.bf16 %v129_v52  ;;  %v356_v58 = vunpack.c.h.s8.bf16 %v128_v47  ;;  %v887_v17 = vcombine.high %v1024_v54, %v1029_v55  ;;  %v148_v47 = vld [vmem:[#allocation2 + $0x3a8] sm:$0xff] }
  0xb2   :  { %564 = vmatpush1.bf16.msra.mxu0 %v315_v61  ;;  %736 = vmatpush1.bf16.msra.mxu1 %v317_v62  ;;  %v355_v61 = vunpack.c.h.s8.bf16 %v127_v51  ;;  %v357_v62 = vunpack.c.h.s8.bf16 %v129_v52  ;;  %v147_v51 = vld [vmem:[#allocation2 + $0x3a0] sm:$0xff]  ;;  %v149_v52 = vld [vmem:[#allocation2 + $0x3b0] sm:$0xff] }
  0xb3   :  { %565 = vmatprep.subr.bf16.mxu0 %v320_v63  ;;  %737 = vmatprep.subr.bf16.mxu1 %v322_v0  ;;  %v360_v63 = vunpack.c.l.s8.bf16 %v132_v60  ;;  %v362_v0 = vunpack.c.l.s8.bf16 %v134_v16 }
  0xb6   :  { %566 = vmatpush1.bf16.msra.mxu0 %v319_v3  ;;  %738 = vmatpush1.bf16.msra.mxu1 %v321_v4  ;;  %v359_v3 = vunpack.c.l.s8.bf16 %v131_v1  ;;  %v361_v4 = vunpack.c.l.s8.bf16 %v133_v2 }
  0xb7   :  { %567 = vmatprep.subr.bf16.mxu0 %v324_v5  ;;  %739 = vmatprep.subr.bf16.mxu1 %v326_v6  ;;  %v364_v5 = vunpack.c.h.s8.bf16 %v132_v60  ;;  %v366_v6 = vunpack.c.h.s8.bf16 %v134_v16  ;;  %v154_v60 = vld [vmem:[#allocation2 + $0x3d8] sm:$0xff]  ;;  %v395_v16 = vunpack.c.h.s8.bf16 %v147_v51 }
  0xba   :  { %568 = vmatpush1.bf16.msra.mxu0 %v323_v9  ;;  %740 = vmatpush1.bf16.msra.mxu1 %v325_v10  ;;  %v363_v9 = vunpack.c.h.s8.bf16 %v131_v1  ;;  %v365_v10 = vunpack.c.h.s8.bf16 %v133_v2 }
  0xbb   :  { %569 = vmatprep.subr.bf16.mxu0 %v328_v11  ;;  %741 = vmatprep.subr.bf16.mxu1 %v330_v12  ;;  %v368_v11 = vunpack.c.l.s8.bf16 %v136_v7  ;;  %v370_v12 = vunpack.c.l.s8.bf16 %v138_v8 }
  0xbe   :  { %570 = vmatpush1.bf16.msra.mxu0 %v327_v15  ;;  %742 = vmatpush1.bf16.msra.mxu1 %v329_v18  ;;  %v367_v15 = vunpack.c.l.s8.bf16 %v135_v13  ;;  %v369_v18 = vunpack.c.l.s8.bf16 %v137_v14 }
  0xbf   :  { %571 = vmatprep.subr.bf16.mxu0 %v332_v19  ;;  %743 = vmatprep.subr.bf16.mxu1 %v334_v20  ;;  %v372_v19 = vunpack.c.h.s8.bf16 %v136_v7  ;;  %v374_v20 = vunpack.c.h.s8.bf16 %v138_v8 }
  0xc2   :  { %572 = vmatpush1.bf16.msra.mxu0 %v331_v44  ;;  %744 = vmatpush1.bf16.msra.mxu1 %v333_v45  ;;  %v371_v44 = vunpack.c.h.s8.bf16 %v135_v13  ;;  %v373_v45 = vunpack.c.h.s8.bf16 %v137_v14 }
  0xc3   :  { %573 = vmatprep.subr.bf16.mxu0 %v336_v23  ;;  %745 = vmatprep.subr.bf16.mxu1 %v338_v24  ;;  %v376_v23 = vunpack.c.l.s8.bf16 %v140_v21  ;;  %v378_v24 = vunpack.c.l.s8.bf16 %v142_v22 }
  0xc6   :  { %574 = vmatpush1.bf16.msra.mxu0 %v335_v27  ;;  %746 = vmatpush1.bf16.msra.mxu1 %v337_v28  ;;  %v375_v27 = vunpack.c.l.s8.bf16 %v139_v25  ;;  %v377_v28 = vunpack.c.l.s8.bf16 %v141_v26 }
  0xc7   :  { %575 = vmatprep.subr.bf16.mxu0 %v340_v29  ;;  %747 = vmatprep.subr.bf16.mxu1 %v342_v32  ;;  %v380_v29 = vunpack.c.h.s8.bf16 %v140_v21  ;;  %v382_v32 = vunpack.c.h.s8.bf16 %v142_v22  ;;  %v886_v21 = vcombine.low %v1024_v54, %v1029_v55  ;;  %v809_v22 = vlaneseq }
  0xca   :  { %576 = vmatpush1.bf16.msra.mxu0 %v339_v35  ;;  %748 = vmatpush1.bf16.msra.mxu1 %v341_v36  ;;  %v379_v35 = vunpack.c.h.s8.bf16 %v139_v25  ;;  %v381_v36 = vunpack.c.h.s8.bf16 %v141_v26 }
  0xcb   :  { %577 = vmatprep.subr.bf16.mxu0 %v344_v37  ;;  %749 = vmatprep.subr.bf16.mxu1 %v346_v38  ;;  %v384_v37 = vunpack.c.l.s8.bf16 %v144_v33  ;;  %v386_v38 = vunpack.c.l.s8.bf16 %v146_v34 }
  0xce   :  { %578 = vmatpush1.bf16.msra.mxu0 %v343_v41  ;;  %750 = vmatpush1.bf16.msra.mxu1 %v345_v42  ;;  %v383_v41 = vunpack.c.l.s8.bf16 %v143_v39  ;;  %v385_v42 = vunpack.c.l.s8.bf16 %v145_v40 }
  0xcf   :  { %579 = vmatprep.subr.bf16.mxu0 %v348_v43  ;;  %751 = vmatprep.subr.bf16.mxu1 %v350_v46  ;;  %v388_v43 = vunpack.c.h.s8.bf16 %v144_v33  ;;  %v390_v46 = vunpack.c.h.s8.bf16 %v146_v34 }
  0xd2   :  { %580 = vmatpush1.bf16.msra.mxu0 %v347_v49  ;;  %752 = vmatpush1.bf16.msra.mxu1 %v349_v50  ;;  %v387_v49 = vunpack.c.h.s8.bf16 %v143_v39  ;;  %v389_v50 = vunpack.c.h.s8.bf16 %v145_v40 }
  0xd3   :  { %592 = vmatprep.subr.bf16.mxu0 %v352_v30  ;;  %764 = vmatprep.subr.bf16.mxu1 %v354_v31  ;;  %v392_v30 = vunpack.c.l.s8.bf16 %v148_v47  ;;  %v394_v31 = vunpack.c.l.s8.bf16 %v150_v48 }
  0xd5   :  { %582 = vmatmul.mubr.bf16.vlgmr.msra.gmra.mrb[0].mxu0 %v884_v53  ;;  %754 = vmatmul.mubr.bf16.vlgmr.msra.gmra.mrb[0].mxu1 %v884_v53  ;;  %v391_v53 = vunpack.c.l.s8.bf16 %v147_v51 }
  0xd6   :  { %593 = vmatpush1.bf16.msra.mxu0 %v351_v56  ;;  %765 = vmatpush1.bf16.msra.mxu1 %v353_v57  ;;  %v393_v56 = vunpack.c.l.s8.bf16 %v149_v52  ;;  %v396_v57 = vunpack.c.h.s8.bf16 %v148_v47 }
  0xd7   :  { %594 = vmatprep.subr.bf16.mxu0 %v356_v58  ;;  %766 = vmatprep.subr.bf16.mxu1 %v358_v59  ;;  %v398_v58 = vunpack.c.h.s8.bf16 %v150_v48  ;;  %v152_v59 = vld [vmem:[#allocation2 + $0x3c8] sm:$0xff] }
  0xd8   :  { %624 = vmatprep.mubr.bf16.mxu0 %v887_v17  ;;  %796 = vmatprep.mubr.bf16.mxu1 %v887_v17  ;;  %v397_v17 = vunpack.c.h.s8.bf16 %v149_v52 }
  0xda   :  { %595 = vmatpush1.bf16.msra.mxu0 %v355_v61  ;;  %767 = vmatpush1.bf16.msra.mxu1 %v357_v62  ;;  %v400_v61 = vunpack.c.l.s8.bf16 %v152_v59  ;;  %v402_v62 = vunpack.c.l.s8.bf16 %v154_v60 }
  0xdb   :  { %596 = vmatprep.subr.bf16.mxu0 %v360_v63  ;;  %768 = vmatprep.subr.bf16.mxu1 %v362_v0  ;;  %v151_v63 = vld [vmem:[#allocation2 + $0x3c0] sm:$0xff]  ;;  %v153_v0 = vld [vmem:[#allocation2 + $0x3d0] sm:$0xff] }
  0xdc   :  { %v399_v1 = vunpack.c.l.s8.bf16 %v151_v63  ;;  %v401_v2 = vunpack.c.l.s8.bf16 %v153_v0  ;;  %v403_v7 = vunpack.c.h.s8.bf16 %v151_v63  ;;  %v405_v8 = vunpack.c.h.s8.bf16 %v153_v0 }
  0xde   :  { %597 = vmatpush1.bf16.msra.mxu0 %v359_v3  ;;  %769 = vmatpush1.bf16.msra.mxu1 %v361_v4  ;;  %v404_v3 = vunpack.c.h.s8.bf16 %v152_v59  ;;  %v406_v4 = vunpack.c.h.s8.bf16 %v154_v60 }
  0xdf   :  { %598 = vmatprep.subr.bf16.mxu0 %v364_v5  ;;  %770 = vmatprep.subr.bf16.mxu1 %v366_v6  ;;  %v156_v5 = vld [vmem:[#allocation2 + $0x3e8] sm:$0xff]  ;;  %v158_v6 = vld [vmem:[#allocation2 + $0x3f8] sm:$0xff] }
  0xe2   :  { %599 = vmatpush1.bf16.msra.mxu0 %v363_v9  ;;  %771 = vmatpush1.bf16.msra.mxu1 %v365_v10  ;;  %v408_v9 = vunpack.c.l.s8.bf16 %v156_v5  ;;  %v410_v10 = vunpack.c.l.s8.bf16 %v158_v6 }
  0xe3   :  { %600 = vmatprep.subr.bf16.mxu0 %v368_v11  ;;  %772 = vmatprep.subr.bf16.mxu1 %v370_v12  ;;  %v155_v11 = vld [vmem:[#allocation2 + $0x3e0] sm:$0xff]  ;;  %v157_v12 = vld [vmem:[#allocation2 + $0x3f0] sm:$0xff] }
  0xe4   :  { %v407_v13 = vunpack.c.l.s8.bf16 %v155_v11  ;;  %v409_v14 = vunpack.c.l.s8.bf16 %v157_v12 }
  0xe6   :  { %601 = vmatpush1.bf16.msra.mxu0 %v367_v15  ;;  %773 = vmatpush1.bf16.msra.mxu1 %v369_v18  ;;  %v412_v15 = vunpack.c.h.s8.bf16 %v156_v5  ;;  %v414_v18 = vunpack.c.h.s8.bf16 %v158_v6 }
  0xe7   :  { %602 = vmatprep.subr.bf16.mxu0 %v372_v19  ;;  %774 = vmatprep.subr.bf16.mxu1 %v374_v20  ;;  %v411_v19 = vunpack.c.h.s8.bf16 %v155_v11  ;;  %v413_v20 = vunpack.c.h.s8.bf16 %v157_v12 }
  0xea   :  { %603 = vmatpush1.bf16.msra.mxu0 %v371_v44  ;;  %775 = vmatpush1.bf16.msra.mxu1 %v373_v45  ;;  %v810_v44 = vshrl.u32 %v809_v22, 7 }
  0xeb   :  { %604 = vmatprep.subr.bf16.mxu0 %v376_v23  ;;  %776 = vmatprep.subr.bf16.mxu1 %v378_v24  ;;  %v807_v24 = vld [vmem:[%s1067_s2] sm:$0xf] }
  0xec   :  { %v811_v45 = vsub.s32 0, %v810_v44  ;;  %v819_v23 = vsub.s32 2, %v810_v44  ;;  %v815_v25 = vsub.s32 1, %v810_v44  ;;  %v823_v26 = vsub.s32 3, %v810_v44 }
  0xee   :  { %605 = vmatpush1.bf16.msra.mxu0 %v375_v27  ;;  %777 = vmatpush1.bf16.msra.mxu1 %v377_v28  ;;  %v837_v27 = vld [vmem:[%s1068_s3] sm:$0xf]  ;;  %v812_v28 = vrot.slane %v807_v24, %v811_v45  ;;  %v820_v54 = vrot.slane %v807_v24, %v819_v23  ;;  %v816_v55 = vrot.slane %v807_v24, %v815_v25 }
  0xef   :  { %606 = vmatprep.subr.bf16.mxu0 %v380_v29  ;;  %778 = vmatprep.subr.bf16.mxu1 %v382_v32  ;;  %v824_v29 = vrot.slane %v807_v24, %v823_v26  ;;  %v842_v32 = vrot.slane %v837_v27, %v811_v45  ;;  %v850_v33 = vrot.slane %v837_v27, %v819_v23 }
  0xf2   :  { %607 = vmatpush1.bf16.msra.mxu0 %v379_v35  ;;  %779 = vmatpush1.bf16.msra.mxu1 %v381_v36  ;;  %v846_v36 = vrot.slane %v837_v27, %v815_v25 }
  0xf3   :  { %608 = vmatprep.subr.bf16.mxu0 %v384_v37  ;;  %780 = vmatprep.subr.bf16.mxu1 %v386_v38  ;;  %v854_v37 = vrot.slane %v837_v27, %v823_v26 }
  0xf6   :  { %609 = vmatpush1.bf16.msra.mxu0 %v383_v41  ;;  %781 = vmatpush1.bf16.msra.mxu1 %v385_v42 }
  0xf7   :  { %610 = vmatprep.subr.bf16.mxu0 %v388_v43  ;;  %782 = vmatprep.subr.bf16.mxu1 %v390_v46 }
  0xfa   :  { %611 = vmatpush1.bf16.msra.mxu0 %v387_v49  ;;  %783 = vmatpush1.bf16.msra.mxu1 %v389_v50 }
  0xfb   :  { %612 = vmatprep.subr.bf16.mxu0 %v392_v30  ;;  %784 = vmatprep.subr.bf16.mxu1 %v394_v31 }
  0xfe   :  { %613 = vmatpush1.bf16.msra.mxu0 %v391_v53  ;;  %785 = vmatpush1.bf16.msra.mxu1 %v393_v56 }
  0xff   :  { %614 = vmatprep.subr.bf16.mxu0 %v396_v57  ;;  %786 = vmatprep.subr.bf16.mxu1 %v398_v58 }
 0x102   :  { %615 = vmatpush1.bf16.msra.mxu0 %v395_v16  ;;  %787 = vmatpush1.bf16.msra.mxu1 %v397_v17 }
 0x103   :  { %616 = vmatprep.subr.bf16.mxu0 %v400_v61  ;;  %788 = vmatprep.subr.bf16.mxu1 %v402_v62 }
 0x106   :  { %617 = vmatpush1.bf16.msra.mxu0 %v399_v1  ;;  %789 = vmatpush1.bf16.msra.mxu1 %v401_v2 }
 0x107   :  { %618 = vmatprep.subr.bf16.mxu0 %v404_v3  ;;  %790 = vmatprep.subr.bf16.mxu1 %v406_v4 }
 0x10a   :  { %619 = vmatpush1.bf16.msra.mxu0 %v403_v7  ;;  %791 = vmatpush1.bf16.msra.mxu1 %v405_v8 }
 0x10b   :  { %620 = vmatprep.subr.bf16.mxu0 %v408_v9  ;;  %792 = vmatprep.subr.bf16.mxu1 %v410_v10 }
 0x10e   :  { %621 = vmatpush1.bf16.msra.mxu0 %v407_v13  ;;  %793 = vmatpush1.bf16.msra.mxu1 %v409_v14 }
 0x10f   :  { %622 = vmatprep.subr.bf16.mxu0 %v412_v15  ;;  %794 = vmatprep.subr.bf16.mxu1 %v414_v18 }
 0x112   :  { %623 = vmatpush1.bf16.msra.mxu0 %v411_v19  ;;  %795 = vmatpush1.bf16.msra.mxu1 %v413_v20 }
 0x115   :  { %625 = vmatmul.mubr.bf16.vlgmr.msra.gmra.mrb[0].mxu0 %v886_v21  ;;  %797 = vmatmul.mubr.bf16.vlgmr.msra.gmra.mrb[0].mxu1 %v886_v21 }
 0x1e8   :  { %v626_v34 = vpop.f32.mrb[0].mxu0  ;;  %v798_v35 = vpop.f32.mrb[0].mxu1 }
 0x1e9   :  { %v829_v38 = vmul.f32 %v812_v28, %v626_v34  ;;  %v831_v39 = vmul.f32 %v820_v54, %v798_v35  ;;  %v628_v40 = vpop.f32.mrb[1].mxu0  ;;  %v800_v41 = vpop.f32.mrb[1].mxu1 }
 0x1ea   :  { %v830_v42 = vmul.f32 %v816_v55, %v628_v40  ;;  %v832_v43 = vmul.f32 %v824_v29, %v800_v41  ;;  %v630_v46 = vpop.f32.mrb[2].mxu0  ;;  %v802_v47 = vpop.f32.mrb[2].mxu1 }
 0x1eb   :  { %v859_v48 = vadd.f32 %v842_v32, %v829_v38  ;;  %v861_v49 = vadd.f32 %v850_v33, %v831_v39  ;;  %v833_v50 = vmul.f32 %v812_v28, %v630_v46  ;;  %v835_v30 = vmul.f32 %v820_v54, %v802_v47  ;;  %v632_v31 = vpop.f32.mrb[3].mxu0  ;;  %v804_v51 = vpop.f32.mrb[3].mxu1 }
 0x1ec   :  { %v860_v52 = vadd.f32 %v846_v36, %v830_v42  ;;  %v862_v53 = vadd.f32 %v854_v37, %v832_v43  ;;  %v834_v56 = vmul.f32 %v816_v55, %v632_v31  ;;  %v836_v57 = vmul.f32 %v824_v29, %v804_v51 }
 0x1ed   :  { %867 = vst [vmem:[%s1069_s4] sm:$0xff] %v859_v48  ;;  %869 = vst [vmem:[%s1069_s4 + $0x10] sm:$0xff] %v861_v49  ;;  %v863_v58 = vadd.f32 %v842_v32, %v833_v50  ;;  %v865_v59 = vadd.f32 %v850_v33, %v835_v30 }
 0x1ee   :  { %868 = vst [vmem:[%s1069_s4 + $0x8] sm:$0xff] %v860_v52  ;;  %870 = vst [vmem:[%s1069_s4 + $0x18] sm:$0xff] %v862_v53  ;;  %v864_v60 = vadd.f32 %v846_v36, %v834_v56  ;;  %v866_v16 = vadd.f32 %v854_v37, %v836_v57 }
 0x1ef   :  { %871 = vst [vmem:[%s1069_s4 + $0x20] sm:$0xff] %v863_v58  ;;  %873 = vst [vmem:[%s1069_s4 + $0x30] sm:$0xff] %v865_v59 }
 0x1f0   :  { %872 = vst [vmem:[%s1069_s4 + $0x28] sm:$0xff] %v864_v60  ;;  %874 = vst [vmem:[%s1069_s4 + $0x38] sm:$0xff] %v866_v16 }
 0x1f1   :  { %879 = vsyncpa [#allocation3], 1 }

</bundles_post_ra>
